<compile_context>
chip_gen: v5e
topology: v5e:2x2
jax: 0.10.0
libtpu: 0.0.40
codegen_flags: <defaults>
</compile_context>

<pallas_src>
import functools

import jax
import jax.numpy as jnp
from jax.experimental import pallas as pl
from jax.experimental.pallas import tpu as pltpu

_LANES = 128
_SUBLANES = 8
_MAX_BLOCK_ROWS = 2048   # 2048x128 f32 = 1 MiB per input per pipeline buffer
_CORE_SPLITS = 2         # leading "parallel" axis -> 2 TCs on v7x


def _jsd_kernel(pred_ref, target_ref, out_ref, *, block_rows, blocks_per_core,
                total_rows, needs_mask):
    c = pl.program_id(0)   # core-split axis ("parallel")
    k = pl.program_id(1)   # streaming / reduction axis ("arbitrary")

    # Output block index is constant along k -> it stays resident in VMEM and
    # acts as the per-core (8,128) accumulator (one vreg of carry).
    @pl.when(k == 0)
    def _init():
        out_ref[...] = jnp.zeros_like(out_ref)

    p = jnp.clip(pred_ref[...].astype(jnp.float32), 1e-7, 1.0)
    t = jnp.clip(target_ref[...].astype(jnp.float32), 1e-7, 1.0)
    m = 0.5 * (p + t)
    log_m = jnp.log(m)
    # pointwise 0.5*(M*(logM - logp) + M*(logM - logt))
    elem = m * log_m - 0.5 * m * (jnp.log(p) + jnp.log(t))

    if needs_mask:
        # Zero rows past the end of the (vreg-padded) array: covers both the
        # ragged last block and the duplicated "phantom" block when the block
        # count does not split evenly across the core axis.
        global_block = c * blocks_per_core + k
        local_valid = total_rows - global_block * block_rows
        row_ids = jax.lax.broadcasted_iota(jnp.int32, elem.shape, 0)
        elem = jnp.where(row_ids < local_valid, elem, 0.0)

    # Fold the block down to a single (8,128) vreg with plain VPU adds
    # (no cross-lane movement); the tiny final reduce happens in the wrapper.
    out_ref[...] += jnp.sum(
        elem.reshape(block_rows // _SUBLANES, _SUBLANES, _LANES), axis=0)


def js_divergence(pred, target):
    """Jensen-Shannon divergence, identical math to the PyTorch module."""
    assert pred.shape == target.shape, "pred and target must have the same shape"
    n = pred.size
    inv_n = 1.0 / float(n)

    # Keep native dtype in HBM (bf16 stays bf16); cast to f32 inside the kernel.
    pred_flat = pred.reshape(-1)
    target_flat = target.reshape(-1)

    vreg = _SUBLANES * _LANES  # 1024
    padded = pl.cdiv(n, vreg) * vreg
    if padded != n:
        # Pad only to one (8,128) vreg multiple; zero pads contribute 0 to JSD.
        pred_flat = jnp.pad(pred_flat, (0, padded - n))
        target_flat = jnp.pad(target_flat, (0, padded - n))

    rows = padded // _LANES                   # multiple of 8
    block_rows = min(_MAX_BLOCK_ROWS, rows)   # multiple of 8
    num_blocks = pl.cdiv(rows, block_rows)
    blocks_per_core = pl.cdiv(num_blocks, _CORE_SPLITS)
    grid = (_CORE_SPLITS, blocks_per_core)
    needs_mask = _CORE_SPLITS * blocks_per_core * block_rows != rows

    pred2d = pred_flat.reshape(rows, _LANES)
    target2d = target_flat.reshape(rows, _LANES)

    def in_map(c, k):
        b = c * blocks_per_core + k
        # Clamp phantom blocks back in range; the in-kernel mask zeroes them.
        return (jnp.minimum(b, num_blocks - 1), 0)

    kernel = functools.partial(
        _jsd_kernel,
        block_rows=block_rows,
        blocks_per_core=blocks_per_core,
        total_rows=rows,
        needs_mask=needs_mask,
    )

    partials = pl.pallas_call(
        kernel,
        out_shape=jax.ShapeDtypeStruct(
            (_CORE_SPLITS * _SUBLANES, _LANES), jnp.float32),
        grid_spec=pltpu.PrefetchScalarGridSpec(
            num_scalar_prefetch=0,
            grid=grid,
            in_specs=[
                pl.BlockSpec((block_rows, _LANES), in_map),
                pl.BlockSpec((block_rows, _LANES), in_map),
            ],
            out_specs=pl.BlockSpec((_SUBLANES, _LANES), lambda c, k: (c, 0)),
        ),
        compiler_params=pltpu.CompilerParams(
            dimension_semantics=("parallel", "arbitrary"),
        ),
    )(pred2d, target2d)

    # Tiny epilogue in plain XLA: sum of (2*8, 128) partials + 1/N scale.
    return jnp.sum(partials) * inv_n


def _jsd_reference(pred, target):
    p = jnp.clip(pred.astype(jnp.float32), 1e-7, 1.0)
    t = jnp.clip(target.astype(jnp.float32), 1e-7, 1.0)
    m = 0.5 * (p + t)
    kl_pm = jnp.mean(m * (jnp.log(m) - jnp.log(p)))
    kl_tm = jnp.mean(m * (jnp.log(m) - jnp.log(t)))
    return 0.5 * kl_pm + 0.5 * kl_tm


if __name__ == "__main__":
    key = jax.random.PRNGKey(0)
    k1, k2 = jax.random.split(key)

    shape = (2, 4, 16, 16)
    # Values straddle the clamp range [1e-7, 1] to exercise the clamping path.
    pred = jax.random.uniform(k1, shape, jnp.float32, minval=-0.1, maxval=1.1)
    target = jax.random.uniform(k2, shape, jnp.float32, minval=-0.1, maxval=1.1)

    loss = js_divergence(pred, target)
    loss = jax.block_until_ready(loss)

    ref = _jsd_reference(pred, target)
    assert jnp.allclose(loss, ref, atol=1e-6, rtol=1e-4), (loss, ref)

    print("KERNEL_OK")
</pallas_src>

<mosaic_0001>
module attributes {stable_mosaic.version = 11 : i64} {
  func.func @_jsd_kernel(%arg0: i32, %arg1: i32, %arg2: memref<16x128xf32, #tpu.memory_space<vmem>>, %arg3: memref<16x128xf32, #tpu.memory_space<vmem>>, %arg4: memref<8x128xf32, #tpu.memory_space<vmem>>) attributes {dimension_semantics = [#tpu.dimension_semantics<parallel>, #tpu.dimension_semantics<arbitrary>], iteration_bounds = array<i64: 2, 1>, scalar_prefetch = 0 : i64, scratch_operands = 0 : i64, tpu.core_type = #tpu.core_type<tc>, window_params = [{transform_indices = @transform_0, window_bounds = array<i64: 16, 128>}, {transform_indices = @transform_1, window_bounds = array<i64: 16, 128>}, {transform_indices = @transform_2, window_bounds = array<i64: 8, 128>}]} {
    %c0_i32 = arith.constant 0 : i32
    %0 = arith.cmpi eq, %arg1, %c0_i32 : i32
    %1 = arith.extui %0 : i1 to i32
    %c0_i32_0 = arith.constant 0 : i32
    %2 = arith.cmpi ne, %1, %c0_i32_0 : i32
    scf.if %2 {
      %cst_16 = arith.constant 0.000000e+00 : f32
      %39 = vector.broadcast %cst_16 : f32 to vector<8x128xf32>
      %c0_17 = arith.constant 0 : index
      %c0_18 = arith.constant 0 : index
      %40 = vector.load %arg4[%c0_17, %c0_18] : memref<8x128xf32, #tpu.memory_space<vmem>>, vector<8x128xf32>
      tpu.vector_store %arg4[%c0_17, %c0_18], %39 {strides = array<i32>} : memref<8x128xf32, #tpu.memory_space<vmem>>, vector<8x128xf32>,
    } else {
    }
    %c0 = arith.constant 0 : index
    %c0_1 = arith.constant 0 : index
    %3 = vector.load %arg2[%c0, %c0_1] : memref<16x128xf32, #tpu.memory_space<vmem>>, vector<16x128xf32>
    %cst = arith.constant 1.000000e-07 : f32
    %cst_2 = arith.constant 1.000000e+00 : f32
    %4 = vector.broadcast %cst : f32 to vector<16x128xf32>
    %5 = arith.maximumf %4, %3 : vector<16x128xf32>
    %6 = vector.broadcast %cst_2 : f32 to vector<16x128xf32>
    %7 = arith.minimumf %6, %5 : vector<16x128xf32>
    %c0_3 = arith.constant 0 : index
    %c0_4 = arith.constant 0 : index
    %8 = vector.load %arg3[%c0_3, %c0_4] : memref<16x128xf32, #tpu.memory_space<vmem>>, vector<16x128xf32>
    %cst_5 = arith.constant 1.000000e-07 : f32
    %cst_6 = arith.constant 1.000000e+00 : f32
    %9 = vector.broadcast %cst_5 : f32 to vector<16x128xf32>
    %10 = arith.maximumf %9, %8 : vector<16x128xf32>
    %11 = vector.broadcast %cst_6 : f32 to vector<16x128xf32>
    %12 = arith.minimumf %11, %10 : vector<16x128xf32>
    %13 = arith.addf %7, %12 : vector<16x128xf32>
    %cst_7 = arith.constant 5.000000e-01 : f32
    %14 = vector.broadcast %cst_7 : f32 to vector<16x128xf32>
    %15 = arith.mulf %14, %13 : vector<16x128xf32>
    %16 = math.log %15 : vector<16x128xf32>
    %17 = arith.mulf %15, %16 : vector<16x128xf32>
    %cst_8 = arith.constant 5.000000e-01 : f32
    %18 = vector.broadcast %cst_8 : f32 to vector<16x128xf32>
    %19 = arith.mulf %18, %15 : vector<16x128xf32>
    %20 = math.log %7 : vector<16x128xf32>
    %21 = math.log %12 : vector<16x128xf32>
    %22 = arith.addf %20, %21 : vector<16x128xf32>
    %23 = arith.mulf %19, %22 : vector<16x128xf32>
    %24 = arith.subf %17, %23 : vector<16x128xf32>
    %c1_i32 = arith.constant 1 : i32
    %25 = arith.muli %arg0, %c1_i32 : i32
    %26 = arith.addi %25, %arg1 : i32
    %c16_i32 = arith.constant 16 : i32
    %27 = arith.muli %26, %c16_i32 : i32
    %c16_i32_9 = arith.constant 16 : i32
    %28 = arith.subi %c16_i32_9, %27 : i32
    %29 = tpu.iota {dimensions = array<i32: 0>} : vector<16x128xi32>
    %30 = vector.broadcast %28 : i32 to vector<16x128xi32>
    %31 = arith.cmpi slt, %29, %30 : vector<16x128xi32>
    %cst_10 = arith.constant 0.000000e+00 : f32
    %32 = vector.broadcast %cst_10 : f32 to vector<16x128xf32>
    %33 = arith.select %31, %24, %32 : vector<16x128xi1>, vector<16x128xf32>
    %c0_11 = arith.constant 0 : index
    %c0_12 = arith.constant 0 : index
    %34 = vector.load %arg4[%c0_11, %c0_12] : memref<8x128xf32, #tpu.memory_space<vmem>>, vector<8x128xf32>
    %35 = vector.shape_cast %33 : vector<16x128xf32> to vector<2x8x128xf32>
    %cst_13 = arith.constant dense<0.000000e+00> : vector<8x128xf32>
    %36 = vector.multi_reduction <add>, %35, %cst_13 [0] : vector<2x8x128xf32> to vector<8x128xf32>
    %37 = arith.addf %34, %36 : vector<8x128xf32>
    %c0_14 = arith.constant 0 : index
    %c0_15 = arith.constant 0 : index
    %38 = vector.load %arg4[%c0_14, %c0_15] : memref<8x128xf32, #tpu.memory_space<vmem>>, vector<8x128xf32>
    tpu.vector_store %arg4[%c0_14, %c0_15], %37 {strides = array<i32>} : memref<8x128xf32, #tpu.memory_space<vmem>>, vector<8x128xf32>,
    return
  }
  func.func @transform_0(%arg0: i32, %arg1: i32) -> (i32, i32) {
    %c1_i32 = arith.constant 1 : i32
    %0 = arith.muli %arg0, %c1_i32 : i32
    %1 = arith.addi %0, %arg1 : i32
    %c0_i32 = arith.constant 0 : i32
    %2 = arith.minsi %1, %c0_i32 : i32
    %c0_i32_0 = arith.constant 0 : i32
    %c0_i32_1 = arith.constant 0 : i32
    return %2, %c0_i32_0 : i32, i32
  }
  func.func @transform_1(%arg0: i32, %arg1: i32) -> (i32, i32) {
    %c1_i32 = arith.constant 1 : i32
    %0 = arith.muli %arg0, %c1_i32 : i32
    %1 = arith.addi %0, %arg1 : i32
    %c0_i32 = arith.constant 0 : i32
    %2 = arith.minsi %1, %c0_i32 : i32
    %c0_i32_0 = arith.constant 0 : i32
    %c0_i32_1 = arith.constant 0 : i32
    return %2, %c0_i32_0 : i32, i32
  }
  func.func @transform_2(%arg0: i32, %arg1: i32) -> (i32, i32) {
    %c0_i32 = arith.constant 0 : i32
    %c0_i32_0 = arith.constant 0 : i32
    return %arg0, %c0_i32 : i32, i32
  }
}

</mosaic_0001>

<bundles_post_ra>
// kernel: tpu_custom_call.1
= control target key start
LH: loop header
LB: loop body
LE: loop exit
PB: predicated region body
PF: predicated region fallthrough
CT: control target
= control target key end

     0   :  { %7 = vsyncpa [#allocation3], 0  ;;  %s907_s0 = inlined_call_operand.hbm [shape: f32[16,128], index: 0, kind: input, shape index: {}]   ;;  %s908_s1 = inlined_call_operand.hbm [shape: f32[16,128], index: 1, kind: input, shape index: {}]   ;;  %s909_s2 = inlined_call_operand.hbm [shape: f32[16,128], index: 2, kind: output, shape index: {}]  }
   0x1   :  { %9 = vsyncpa [#allocation3 + $0x1], 0 }
   0x2   :  { %10 = vsyncpa [#allocation6], 0 }
   0x3   :  { %12 = vsyncpa [#allocation6 + $0x1], 0 }
   0x4   :  { %13 = vsyncpa [#allocation4], 0 }
   0x5   :  { %15 = vsyncpa [#allocation4 + $0x1], 0  ;;  %s734_s9 = smov 0   ;;  %s736_s10 = smov 0  }
   0x6   :  { %s738_s11 = smov 0   ;;  %s740_s12 = smov 0  }
   0x7   :  { %s742_s13 = smov 0   ;;  %s744_s14 = smov 0  }
   0x8   :  { %s746_s15 = smov 0   ;;  %s748_s16 = smov 0  }
   0x9 LB: > { %s419_s17 = sadd.s32 4294967295, %s713_s16   ;;  %s420_s18 = sadd.s32 4294967294, %s713_s16   ;;  %s713_s16 = sphi %s748_s16, %s21_s16   ;;  %s709_s15 = sphi %s746_s15, %s921_s15   ;;  %s705_s14 = sphi %s744_s14, %s920_s14   ;;  %s701_s13 = sphi %s742_s13, %s897_s13   ;;  %s697_s12 = sphi %s740_s12, %s919_s12   ;;  %s693_s11 = sphi %s738_s11, %s918_s11   ;;  %s689_s10 = sphi %s736_s10, %s917_s10   ;;  %s685_s9 = sphi %s734_s9, %s916_s9  }
   0xa   : > { %s33_s19 = sadd.s32 1, %s709_s15  ;;  %p682_p1 = scmp.ne.s32.totalorder %s701_s13, 0 }
   0xb   : > { %p35_p0 = scmp.ge.s32.totalorder %s33_s19, 2  ;;  %p54_p2 = scmp.eq.s32.totalorder %s713_s16, 0 }
   0xc   : > { %p59_p3 = scmp.ne.s32.totalorder %s701_s13, %s697_s12  ;;  %p60_p5 = scmp.eq.s32.totalorder %s419_s17, 0 }
   0xd   : > { %s923_s19 = smov (%p35_p0, %s33_s19), 0  ;;  %p780_p4 = por %p682_p1, %p54_p2 }
   0xe   : > { %p784_p6 = por %p60_p5, %p59_p3  ;;  %s101_s22 = ssub.s32 %s709_s15, %s923_s19 }
   0xf   : > { %p102_p7 = scmp.eq.s32.totalorder %s101_s22, 0  ;;  %s104_s23 = sadd.s32 1, %s693_s11 }
  0x10   : > { %p114_p8 = scmp.ne.s32.totalorder %s693_s11, %s689_s10  ;;  %p115_p9 = scmp.eq.s32.totalorder %s419_s17, 1 }
  0x11   : > { %s792_s24 = scalar_select %p102_p7, %s693_s11, %s104_s23  }
  0x12   : > { %p120_p10 = scmp.ne.s32.totalorder %s689_s10, %s685_s9  ;;  %p121_p11 = scmp.eq.s32.totalorder %s420_s18, 1 }
  0x13   : > { %p798_p12 = por %p115_p9, %p114_p8  ;;  %p422_p13 = scmp.ge.s32.totalorder %s713_s16, 2 }
  0x14   : > { %p803_p0 = por %p121_p11, %p120_p10  ;;  %p457_p1 = scmp.lt.s32.totalorder %s713_s16, 2 }
  0x15   : > { %s154_s29 = sshll.u32 %s907_s0, 4  ;;  %s715_s30 = smov [#allocation2]   ;;  %s155_s29 = int_to_ptr.hbm [resolvable:$true] %s154_s29 }
  0x16   : > { %s156_s3 = sshll.u32 %s715_s30, 4  ;;  %p813_p2 = pnand %p457_p1, %p780_p4  ;;  %s157_s3 = int_to_ptr.vmem [resolvable:$true] %s156_s3 }
  0x17   : > { %p429_p3 = scmp.ge.s32.totalorder %s713_s16, 1  ;;  %p189_p5 = scmp.lt.s32.totalorder %s713_s16, 3 }
  0x18   : > { %s546_s5 = sshra.s32 %s155_s29, 4  ;;  %p550_p8 = pneg %p813_p2  ;;  %s547_s5 = int_to_ptr.hbm [resolvable:$true] %s546_s5 }
  0x19   : > { %s548_s6 = scalar_lea.hbm %s547_s5, 16  ;;  %s553_s12 = scalar_lea.hbm %s907_s0, 16 }
  0x1a   : > { %p549_p7 = scmp.ne.s32.totalorder %s547_s5, %s548_s6  ;;  %p555_p4 = scmp.lt.s32.totalorder %s553_s12, %s548_s6 }
  0x1c   : > { %p551_p9 = pnand %p550_p8, %p549_p7 }
  0x1e   : > { %p552_p10 = pneg %p551_p9 }
  0x20   : > { %p557_p11 = pnand %p555_p4, %p552_p10 }
  0x22   : > { %560 = shalt.err (!%p557_p11)
}
  0x23   : > { %s716_s17 = smov 128   ;;  %s717_s18 = smov 8  }
  0x24   : > { %449 = dma.hbm_to_vmem [thread:$0]  (!%p813_p2), %s155_s29, 256, %s157_s3, [#allocation3], %s716_s17, %s716_s17, %s717_s18  }
  0x25   : > { %p833_p1 = pnand %p429_p3, %p189_p5  ;;  %s179_s27 = sshll.u32 %s908_s1, 4  ;;  %s180_s27 = int_to_ptr.hbm [resolvable:$true] %s179_s27 }
  0x26   : > { %s718_s28 = smov [#allocation5]   ;;  %s576_s5 = sshra.s32 %s180_s27, 4  ;;  %s577_s5 = int_to_ptr.hbm [resolvable:$true] %s576_s5 }
  0x27   : > { %s181_s30 = sshll.u32 %s718_s28, 4  ;;  %s578_s6 = scalar_lea.hbm %s577_s5, 16  ;;  %s182_s30 = int_to_ptr.vmem [resolvable:$true] %s181_s30 }
  0x28   : > { %p579_p7 = scmp.ne.s32.totalorder %s577_s5, %s578_s6  ;;  %s583_s7 = scalar_lea.hbm %s908_s1, 16 }
  0x29   : > { %p585_p3 = scmp.lt.s32.totalorder %s583_s7, %s578_s6 }
  0x2a   : > { %p581_p9 = pnand %p579_p7, %p550_p8 }
  0x2c   : > { %p582_p10 = pneg %p581_p9 }
  0x2e   : > { %p587_p5 = pnand %p585_p3, %p582_p10 }
  0x30   : > { %590 = shalt.err (!%p587_p5)
}
  0x31   : > { %452 = dma.hbm_to_vmem [thread:$0]  (!%p813_p2), %s180_s27, 256, %s182_s30, [#allocation6], %s716_s17, %s716_s17, %s717_s18  }
  0x32   : > { %193 = sbr.rel (%p833_p1) target bundleno = 88 (0x58), region = 28  ;;  %s195_s8 = sand.u32 (!%p833_p1), 1, %s701_s13  }
  0x33   : > { %s430_s12 = sshll.u32 (!%p833_p1), %s195_s8, 4  ;;  %s196_s22 = scalar_lea.sflag (!%p833_p1), [#allocation3], %s195_s8 }
  0x34   : > { %s199_s23 = scalar_lea.vmem (!%p833_p1), [#allocation2], %s430_s12 }
  0x37   : > { %671 = dma.done.wait (%p784_p6), %s196_s22, 256  }
  0x38   : > { %673 = vsyncadd (%p784_p6), %s196_s22, 4294967040  ;;  %s206_s28 = scalar_lea.sflag [#allocation6], %s195_s8  ;;  %s209_s5 = scalar_lea.vmem [#allocation5], %s430_s12 }
  0x39   : > { %675 = dma.done.wait (%p784_p6), %s206_s28, 256  }
  0x3a   : > { %677 = vsyncadd (%p784_p6), %s206_s28, 4294967040  ;;  %v249_v0 = vld [vmem:[%s199_s23] sm:$0xff]  ;;  %v250_v1 = vld [vmem:[%s199_s23 + $0x8] sm:$0xff]  ;;  %v290_v16 = vlaneseq  ;;  %s433_s21 = sshll.u32 %s705_s14, 4  ;;  %s233_s17 = sand.u32 1, %s689_s10  }
  0x3b   : > { %v255_v2 = vld [vmem:[%s209_s5] sm:$0xff]  ;;  %v251_v3 = vmax.f32 %v249_v0, 1e-07  ;;  %v252_v4 = vmax.f32 %v250_v1, 1e-07  ;;  %v256_v5 = vld [vmem:[%s209_s5 + $0x8] sm:$0xff] }
  0x3c   : > { %v257_v6 = vmax.f32 %v255_v2, 1e-07  ;;  %v258_v7 = vmax.f32 %v256_v5, 1e-07  ;;  %v291_v22 = vshrl.u32 %v290_v16, 7  ;;  %s289_s4 = ssub.s32 16, %s433_s21 }
  0x3d   : > { %v253_v8 = vmin.f32 %v251_v3, 1.0  ;;  %v254_v9 = vmin.f32 %v252_v4, 1.0  ;;  %v293_v34 = vstv %s289_s4  ;;  %s432_s18 = sshll.u32 %s233_s17, 3  ;;  %s435_s20 = sshll.u32 %s705_s14, 3 }
  0x3e   : > { %v259_v10 = vmin.f32 %v257_v6, 1.0  ;;  %v260_v11 = vmin.f32 %v258_v7, 1.0  ;;  %v292_v33 = vadd.s32 8, %v291_v22  ;;  %vm294_vm0 = vcmp.lt.s32.totalorder %v291_v22, %v293_v34  ;;  %s313_s6 = scalar_lea.hbm %s909_s2, %s435_s20  ;;  %s235_s29 = scalar_lea.vmem [#allocation7], %s432_s18 }
  0x3f   : > { %534 = vlog2.f32 %v253_v8  ;;  %s315_s3 = sshll.u32 %s235_s29, 4  ;;  %s317_s7 = sshll.u32 %s313_s6, 4  ;;  %s316_s3 = int_to_ptr.vmem [resolvable:$true] %s315_s3  ;;  %s318_s7 = int_to_ptr.hbm [resolvable:$true] %s317_s7 }
  0x40   : > { %v261_v12 = vadd.f32 %v259_v10, %v253_v8  ;;  %v262_v13 = vadd.f32 %v260_v11, %v254_v9  ;;  %536 = vlog2.f32 %v254_v9  ;;  %vm295_vm1 = vcmp.lt.s32.totalorder %v292_v33, %v293_v34  ;;  %s303_s14 = scalar_lea.sflag [#allocation4], %s233_s17  ;;  %s620_s8 = sshra.s32 %s318_s7, 4  ;;  %s621_s8 = int_to_ptr.hbm [resolvable:$true] %s620_s8 }
  0x41   : > { %538 = vlog2.f32 %v259_v10  ;;  %s622_s12 = scalar_lea.hbm %s621_s8, 8  ;;  %s626_s28 = scalar_lea.hbm %s909_s2, 16 }
  0x42   : > { %v263_v14 = vmul.f32 0.5, %v261_v12  ;;  %v264_v15 = vmul.f32 0.5, %v262_v13  ;;  %540 = vlog2.f32 %v260_v11  ;;  %p623_p6 = scmp.ne.s32.totalorder %s621_s8, %s622_s12  ;;  %p627_p4 = scmp.lt.s32.totalorder %s621_s8, %s909_s2 }
  0x43   : > { %p628_p11 = scmp.lt.s32.totalorder %s626_s28, %s622_s12 }
  0x44   : > { %542 = vlog2.f32 %v263_v14  ;;  %v271_v24 = vmul.f32 0.5, %v263_v14  ;;  %v272_v26 = vmul.f32 0.5, %v264_v15  ;;  %p624_p2 = pnand %p623_p6, %p798_p12 }
  0x45   : > { %v535_v17 = vpop.eup %534  ;;  %544 = vlog2.f32 %v264_v15  ;;  %p629_p1 = por %p628_p11, %p627_p4 }
  0x46   : > { %v537_v18 = vpop.eup %536  ;;  %v274_v19 = vmul.f32 0.6931472, %v535_v17  ;;  %p625_p8 = pneg %p624_p2 }
  0x47   : > { %v539_v20 = vpop.eup %538  ;;  %v276_v21 = vmul.f32 0.6931472, %v537_v18 }
  0x48   : > { %v541_v23 = vpop.eup %540  ;;  %v278_v25 = vmul.f32 0.6931472, %v539_v20  ;;  %p630_p7 = pnand %p629_p1, %p625_p8 }
  0x49   : > { %v280_v27 = vmul.f32 0.6931472, %v541_v23 }
  0x4a   : > { %v543_v28 = vpop.eup %542  ;;  %v281_v29 = vadd.f32 %v278_v25, %v274_v19 }
  0x4b   : > { %v545_v30 = vpop.eup %544  ;;  %v266_v31 = vmul.f32 0.6931472, %v543_v28  ;;  %v282_v32 = vadd.f32 %v280_v27, %v276_v21 }
  0x4c   : > { %v268_v35 = vmul.f32 0.6931472, %v545_v30  ;;  %v283_v36 = vmul.f32 %v281_v29, %v271_v24 }
  0x4d   : > { %v269_v37 = vmul.f32 %v266_v31, %v263_v14  ;;  %v284_v38 = vmul.f32 %v282_v32, %v272_v26 }
  0x4e   : > { %v270_v39 = vmul.f32 %v268_v35, %v264_v15 }
  0x4f   : > { %v285_v40 = vsub.f32 %v269_v37, %v283_v36 }
  0x50   : > { %v286_v41 = vsub.f32 %v270_v39, %v284_v38 }
  0x51   : > { %v296_v42 = vsel %vm294_vm0, %v285_v40, 0.0 }
  0x52   : > { %v297_v43 = vsel %vm295_vm1, %v286_v41, 0.0 }
  0x53   : > { %v299_v44 = vadd.f32 %v297_v43, %v296_v42 }
  0x55   : > { %301 = vst [vmem:[%s235_s29] sm:$0xff] %v299_v44 }
  0x56   : > { %633 = shalt.err (!%p630_p7)
}
  0x57   : > { %444 = dma.vmem_to_hbm [thread:$0]  (%p798_p12), %s316_s3, 128, %s318_s7, %s303_s14  }
  0x58 PF: > { %s329_s4 = sand.u32 1, %s685_s9   ;;  %p454_p9 = pnand %p422_p13, %p803_p0 }
  0x59   : > { %s330_s17 = scalar_lea.sflag [#allocation4], %s329_s4 }
  0x5a   : > { %p455_p10 = pneg %p454_p9 }
  0x5c   : > { %679 = dma.done.wait (%p455_p10), %s330_s17, 128  }
  0x5d   : > { %681 = vsyncadd (%p455_p10), %s330_s17, 4294967168  ;;  %s21_s16 = sadd.s32 1, %s713_s16   ;;  %s916_s9 = smov %s689_s10 }
  0x5e   : > { %p18_p3 = scmp.ge.s32.totalorder %s21_s16, 4   ;;  %s917_s10 = smov %s693_s11 }
  0x5f   : > { %s918_s11 = smov %s792_s24  ;;  %s919_s12 = smov %s701_s13 }
  0x60   : > { %s897_s13 = smov 0   ;;  %s920_s14 = smov %s709_s15 }
  0x61   : > { %s921_s15 = smov %s923_s19  ;;  %20 = sbr.rel (!%p18_p3) target bundleno = 9 (0x9), region = 90 }
  0x66   :  { %336 = vsyncpa [#allocation3], 1 }
  0x67   :  { %338 = vsyncpa [#allocation3 + $0x1], 1 }
  0x68   :  { %339 = vsyncpa [#allocation6], 1 }
  0x69   :  { %341 = vsyncpa [#allocation6 + $0x1], 1 }
  0x6a   :  { %342 = vsyncpa [#allocation4], 1 }
  0x6b   :  { %344 = vsyncpa [#allocation4 + $0x1], 1 }

</bundles_post_ra>
